<compile_context>
chip_gen: v7x
topology: tpu7x:2x2x1
jax: 0.10.0
libtpu: 0.0.40
codegen_flags: <defaults>
</compile_context>

<pallas_src>
import jax
import jax.numpy as jnp
from jax import lax
from jax.experimental import pallas as pl
from jax.experimental.pallas import tpu as pltpu

STEM_OUT_CHANNELS = 64
EPS = 1e-5


# ---------------------------------------------------------------------------
# Wrapper + fused kernel
# ---------------------------------------------------------------------------
def stem_with_batchnorm(x_nchw, conv_w, gamma, beta, run_mean, run_var):
    N, Cin, H, W = x_nchw.shape
    Cout = conv_w.shape[0]
    k, stride, pad = 7, 2, 3
    Ho = (H + 2 * pad - k) // stride + 1
    Wo = (W + 2 * pad - k) // stride + 1
    Hp = (Ho - 1) // 2 + 1          # 3x3/s2/p1 maxpool output size
    Wp = (Wo - 1) // 2 + 1
    K = k * k * Cin

    # pooled-row band size (each band owns 2*TP conv rows, no overlap)
    TP = min(16, Hp)
    for cand in range(TP, 7, -1):
        if Hp % cand == 0:
            TP = cand
            break
    NB = pl.cdiv(Hp, TP)
    Ho_b = 2 * TP * NB              # conv rows covered by the banded grid (>= Ho)
    Wo_e = 2 * Wp                   # even-ized conv width (>= Wo)
    RB = 2 * TP * Wo_e              # conv pixels per band (matmul LHS rows)

    # ---- glue: im2col (channels-last patches), built once in XLA, cast to bf16 ----
    x_nhwc = jnp.transpose(x_nchw, (0, 2, 3, 1)).astype(jnp.float32)
    xp = jnp.pad(x_nhwc, ((0, 0), (pad, pad), (pad, pad), (0, 0)))
    taps = []
    for di in range(k):
        for dj in range(k):
            taps.append(xp[:, di:di + stride * Ho:stride,
                           dj:dj + stride * Wo:stride, :])
    patches = jnp.stack(taps, axis=3).reshape(N, Ho, Wo, K)

    # Edge-pad conv rows/cols to the banded/even-ized extent (a duplicated row/col
    # can never change a max-pool window's result), then reorder columns as
    # [all even wo | all odd wo] so the kernel pools with contiguous slices only.
    patches = jnp.pad(patches, ((0, 0), (0, Ho_b - Ho), (0, Wo_e - Wo), (0, 0)),
                      mode="edge")
    patches = jnp.concatenate([patches[:, :, 0::2, :], patches[:, :, 1::2, :]],
                              axis=2)
    patches = patches.reshape(N * NB, RB, K).astype(jnp.bfloat16)

    # conv weight [Cout, Cin, kh, kw] -> [kh*kw*Cin, Cout], eval-mode BN scale folded
    inv_std = 1.0 / jnp.sqrt(run_var.astype(jnp.float32) + EPS)
    scale = gamma.astype(jnp.float32) * inv_std
    w_mat = jnp.transpose(conv_w, (2, 3, 1, 0)).reshape(K, Cout).astype(jnp.float32)
    w_mat = (w_mat * scale[None, :]).astype(jnp.bfloat16)
    bias = (beta.astype(jnp.float32) - run_mean.astype(jnp.float32) * scale)
    bias = bias.reshape(1, Cout)

    def _stem_kernel(p_ref, w_ref, b_ref, o_ref, act_ref, carry_ref):
        band = pl.program_id(1)

        @pl.when(band == 0)
        def _():
            # pool halo above the image: zero == -inf here (values are post-ReLU)
            carry_ref[...] = jnp.zeros((Wp, Cout), jnp.float32)

        # 7x7/s2 conv as im2col matmul (bf16 in, f32 acc) + folded-BN bias + ReLU
        acts = jnp.dot(p_ref[...], w_ref[...],
                       preferred_element_type=jnp.float32)
        acts = jnp.maximum(acts + b_ref[...], 0.0)              # (RB, Cout)
        acts = acts.reshape(2 * TP, Wo_e, Cout)                 # cols: [even | odd]

        evens = acts[:, :Wp, :]                                 # conv col 2*wp
        odds = acts[:, Wp:, :]                                  # conv col 2*wp + 1
        # stage the odd columns shifted right by one, zero column at wp == 0
        act_ref[:, 0:1, :] = jnp.zeros((2 * TP, 1, Cout), jnp.float32)
        act_ref[:, 1:Wp + 1, :] = odds
        lefts = act_ref[:, 0:Wp, :]                             # conv col 2*wp - 1
        hpool = jnp.maximum(jnp.maximum(lefts, evens), odds)    # (2*TP, Wp, Cout)

        prev = carry_ref[...]            # h-pooled conv row (2*band*TP - 1)
        for t in range(TP):              # vertical 3-tap / stride-2 max pool
            top = prev if t == 0 else hpool[2 * t - 1]
            o_ref[t] = jnp.maximum(jnp.maximum(top, hpool[2 * t]),
                                   hpool[2 * t + 1])
        carry_ref[...] = hpool[2 * TP - 1]   # halo row for the next band

    flops = 2 * N * NB * RB * K * Cout
    bytes_accessed = (patches.size * 2 + w_mat.size * 2 + bias.size * 4
                      + N * NB * TP * Wp * Cout * 4)

    pooled = pl.pallas_call(
        _stem_kernel,
        out_shape=jax.ShapeDtypeStruct((N * NB, TP, Wp, Cout), jnp.float32),
        grid=(N, NB),
        in_specs=[
            pl.BlockSpec((None, RB, K), lambda n, b: (n * NB + b, 0, 0)),
            pl.BlockSpec((K, Cout), lambda n, b: (0, 0)),
            pl.BlockSpec((1, Cout), lambda n, b: (0, 0)),
        ],
        out_specs=pl.BlockSpec((None, TP, Wp, Cout),
                               lambda n, b: (n * NB + b, 0, 0, 0)),
        scratch_shapes=[
            pltpu.VMEM((2 * TP, Wp + 1, Cout), jnp.float32),   # shifted odd cols
            pltpu.VMEM((Wp, Cout), jnp.float32),               # cross-band halo
        ],
        compiler_params=pltpu.CompilerParams(
            dimension_semantics=("parallel", "arbitrary")),
        cost_estimate=pl.CostEstimate(flops=flops, transcendentals=0,
                                      bytes_accessed=bytes_accessed),
    )(patches, w_mat, bias)

    pooled = pooled.reshape(N, NB * TP, Wp, Cout)[:, :Hp]
    # back to NCHW, [N, Cout, H/4, W/4]
    return jnp.transpose(pooled, (0, 3, 1, 2))


# ---------------------------------------------------------------------------
# Pure-JAX reference (for sanity checking)
# ---------------------------------------------------------------------------
def _reference(x, conv_w, gamma, beta, rm, rv):
    y = lax.conv_general_dilated(
        x, conv_w, window_strides=(2, 2), padding=((3, 3), (3, 3)),
        dimension_numbers=("NCHW", "OIHW", "NCHW"))
    scale = gamma / jnp.sqrt(rv + EPS)
    y = y * scale[None, :, None, None] + (beta - rm * scale)[None, :, None, None]
    y = jnp.maximum(y, 0.0)
    y = lax.reduce_window(y, -jnp.inf, lax.max, (1, 1, 3, 3), (1, 1, 2, 2),
                          [(0, 0), (0, 0), (1, 1), (1, 1)])
    return y


if __name__ == "__main__":
    key = jax.random.PRNGKey(0)
    k_x, k_w, k_g, k_b, k_m, k_v = jax.random.split(key, 6)

    N, Cin, H, W = 2, 3, 16, 16
    Cout = STEM_OUT_CHANNELS

    x = jax.random.normal(k_x, (N, Cin, H, W), dtype=jnp.float32)
    conv_w = 0.1 * jax.random.normal(k_w, (Cout, Cin, 7, 7), dtype=jnp.float32)
    gamma = jax.random.uniform(k_g, (Cout,), minval=0.5, maxval=1.5, dtype=jnp.float32)
    beta = 0.1 * jax.random.normal(k_b, (Cout,), dtype=jnp.float32)
    run_mean = 0.1 * jax.random.normal(k_m, (Cout,), dtype=jnp.float32)
    run_var = jax.random.uniform(k_v, (Cout,), minval=0.5, maxval=1.5, dtype=jnp.float32)

    fn = jax.jit(stem_with_batchnorm)
    out = jax.block_until_ready(fn(x, conv_w, gamma, beta, run_mean, run_var))

    ref = jax.block_until_ready(_reference(x, conv_w, gamma, beta, run_mean, run_var))
    assert out.shape == (N, Cout, H // 4, W // 4), out.shape
    assert jnp.allclose(out, ref, rtol=5e-2, atol=5e-2), float(jnp.max(jnp.abs(out - ref)))

    print("KERNEL_OK")
</pallas_src>

<mosaic_0001>
module attributes {stable_mosaic.version = 11 : i64} {
  func.func @_stem_kernel(%arg0: i32, %arg1: i32, %arg2: memref<1x64x147xbf16, #tpu.memory_space<vmem>>, %arg3: memref<147x64xbf16, #tpu.memory_space<vmem>>, %arg4: memref<1x64xf32, #tpu.memory_space<vmem>>, %arg5: memref<1x4x4x64xf32, #tpu.memory_space<vmem>>, %arg6: memref<8x5x64xf32, #tpu.memory_space<vmem>>, %arg7: memref<4x64xf32, #tpu.memory_space<vmem>>) attributes {dimension_semantics = [#tpu.dimension_semantics<parallel>, #tpu.dimension_semantics<arbitrary>], iteration_bounds = array<i64: 2, 1>, scalar_prefetch = 0 : i64, scratch_operands = 2 : i64, tpu.core_type = #tpu.core_type<tc>, window_params = [{transform_indices = @transform_0, window_bounds = array<i64: 1, 64, 147>}, {pipeline_mode = #tpu.pipeline_mode<synchronous>, transform_indices = @transform_1, window_bounds = array<i64: 147, 64>}, {pipeline_mode = #tpu.pipeline_mode<synchronous>, transform_indices = @transform_2, window_bounds = array<i64: 1, 64>}, {transform_indices = @transform_3, window_bounds = array<i64: 1, 4, 4, 64>}]} {
    %c0_i32 = arith.constant 0 : i32
    %0 = arith.cmpi eq, %arg1, %c0_i32 : i32
    %1 = arith.extui %0 : i1 to i32
    %c0_i32_0 = arith.constant 0 : i32
    %2 = arith.cmpi ne, %1, %c0_i32_0 : i32
    scf.if %2 {
      %cst_35 = arith.constant 0.000000e+00 : f32
      %67 = vector.broadcast %cst_35 : f32 to vector<4x64xf32>
      %c0_36 = arith.constant 0 : index
      %c0_37 = arith.constant 0 : index
      %68 = vector.load %arg7[%c0_36, %c0_37] : memref<4x64xf32, #tpu.memory_space<vmem>>, vector<4x64xf32>
      tpu.vector_store %arg7[%c0_36, %c0_37], %67 {strides = array<i32>} : memref<4x64xf32, #tpu.memory_space<vmem>>, vector<4x64xf32>,
    } else {
    }
    %c0 = arith.constant 0 : index
    %c0_1 = arith.constant 0 : index
    %c0_2 = arith.constant 0 : index
    %3 = vector.load %arg2[%c0, %c0_1, %c0_2] : memref<1x64x147xbf16, #tpu.memory_space<vmem>>, vector<1x64x147xbf16>
    %4 = vector.shape_cast %3 : vector<1x64x147xbf16> to vector<64x147xbf16>
    %c0_3 = arith.constant 0 : index
    %c0_4 = arith.constant 0 : index
    %5 = vector.load %arg3[%c0_3, %c0_4] : memref<147x64xbf16, #tpu.memory_space<vmem>>, vector<147x64xbf16>
    %cst = arith.constant dense<0.000000e+00> : vector<64x64xf32>
    %6 = tpu.matmul %4, %5, %cst {dimension_numbers = #tpu.dot_dimension_numbers<[1], [0], [0], [1], [0, 0, 1, 1], [], []>} : vector<64x147xbf16>, vector<147x64xbf16>, vector<64x64xf32> -> vector<64x64xf32>
    %c0_5 = arith.constant 0 : index
    %c0_6 = arith.constant 0 : index
    %7 = vector.load %arg4[%c0_5, %c0_6] : memref<1x64xf32, #tpu.memory_space<vmem>>, vector<1x64xf32>
    %8 = vector.broadcast %7 : vector<1x64xf32> to vector<64x64xf32>
    %9 = arith.addf %6, %8 : vector<64x64xf32>
    %cst_7 = arith.constant 0.000000e+00 : f32
    %10 = vector.broadcast %cst_7 : f32 to vector<64x64xf32>
    %11 = arith.maximumf %9, %10 : vector<64x64xf32>
    %12 = vector.shape_cast %11 : vector<64x64xf32> to vector<8x8x64xf32>
    %13 = vector.extract_strided_slice %12 {offsets = [0, 0, 0], sizes = [8, 4, 64], strides = [1, 1, 1]} : vector<8x8x64xf32> to vector<8x4x64xf32>
    %14 = vector.extract_strided_slice %12 {offsets = [0, 4, 0], sizes = [8, 4, 64], strides = [1, 1, 1]} : vector<8x8x64xf32> to vector<8x4x64xf32>
    %cst_8 = arith.constant 0.000000e+00 : f32
    %15 = vector.broadcast %cst_8 : f32 to vector<8x1x64xf32>
    %c0_9 = arith.constant 0 : index
    %c0_10 = arith.constant 0 : index
    %c0_11 = arith.constant 0 : index
    %16 = vector.load %arg6[%c0_9, %c0_10, %c0_11] : memref<8x5x64xf32, #tpu.memory_space<vmem>>, vector<8x1x64xf32>
    tpu.vector_store %arg6[%c0_9, %c0_10, %c0_11], %15 {strides = array<i32>} : memref<8x5x64xf32, #tpu.memory_space<vmem>>, vector<8x1x64xf32>,
    %c0_12 = arith.constant 0 : index
    %c1 = arith.constant 1 : index
    %c0_13 = arith.constant 0 : index
    %17 = vector.load %arg6[%c0_12, %c1, %c0_13] : memref<8x5x64xf32, #tpu.memory_space<vmem>>, vector<8x4x64xf32>
    tpu.vector_store %arg6[%c0_12, %c1, %c0_13], %14 {strides = array<i32>} : memref<8x5x64xf32, #tpu.memory_space<vmem>>, vector<8x4x64xf32>,
    %c0_14 = arith.constant 0 : index
    %c0_15 = arith.constant 0 : index
    %c0_16 = arith.constant 0 : index
    %18 = vector.load %arg6[%c0_14, %c0_15, %c0_16] : memref<8x5x64xf32, #tpu.memory_space<vmem>>, vector<8x4x64xf32>
    %19 = arith.maximumf %18, %13 : vector<8x4x64xf32>
    %20 = arith.maximumf %19, %14 : vector<8x4x64xf32>
    %c0_17 = arith.constant 0 : index
    %c0_18 = arith.constant 0 : index
    %21 = vector.load %arg7[%c0_17, %c0_18] : memref<4x64xf32, #tpu.memory_space<vmem>>, vector<4x64xf32>
    %22 = vector.extract_strided_slice %20 {offsets = [0, 0, 0], sizes = [1, 4, 64], strides = [1, 1, 1]} : vector<8x4x64xf32> to vector<1x4x64xf32>
    %23 = vector.shape_cast %22 : vector<1x4x64xf32> to vector<4x64xf32>
    %24 = arith.maximumf %21, %23 : vector<4x64xf32>
    %25 = vector.extract_strided_slice %20 {offsets = [1, 0, 0], sizes = [1, 4, 64], strides = [1, 1, 1]} : vector<8x4x64xf32> to vector<1x4x64xf32>
    %26 = vector.shape_cast %25 : vector<1x4x64xf32> to vector<4x64xf32>
    %27 = arith.maximumf %24, %26 : vector<4x64xf32>
    %c0_19 = arith.constant 0 : index
    %c0_20 = arith.constant 0 : index
    %c0_21 = arith.constant 0 : index
    %c0_22 = arith.constant 0 : index
    %28 = vector.load %arg5[%c0_19, %c0_20, %c0_21, %c0_22] : memref<1x4x4x64xf32, #tpu.memory_space<vmem>>, vector<1x1x4x64xf32>
    %29 = vector.shape_cast %28 : vector<1x1x4x64xf32> to vector<4x64xf32>
    %30 = vector.shape_cast %27 : vector<4x64xf32> to vector<1x1x4x64xf32>
    tpu.vector_store %arg5[%c0_19, %c0_20, %c0_21, %c0_22], %30 {strides = array<i32>} : memref<1x4x4x64xf32, #tpu.memory_space<vmem>>, vector<1x1x4x64xf32>,
    %31 = vector.extract_strided_slice %20 {offsets = [1, 0, 0], sizes = [1, 4, 64], strides = [1, 1, 1]} : vector<8x4x64xf32> to vector<1x4x64xf32>
    %32 = vector.shape_cast %31 : vector<1x4x64xf32> to vector<4x64xf32>
    %33 = vector.extract_strided_slice %20 {offsets = [2, 0, 0], sizes = [1, 4, 64], strides = [1, 1, 1]} : vector<8x4x64xf32> to vector<1x4x64xf32>
    %34 = vector.shape_cast %33 : vector<1x4x64xf32> to vector<4x64xf32>
    %35 = arith.maximumf %32, %34 : vector<4x64xf32>
    %36 = vector.extract_strided_slice %20 {offsets = [3, 0, 0], sizes = [1, 4, 64], strides = [1, 1, 1]} : vector<8x4x64xf32> to vector<1x4x64xf32>
    %37 = vector.shape_cast %36 : vector<1x4x64xf32> to vector<4x64xf32>
    %38 = arith.maximumf %35, %37 : vector<4x64xf32>
    %c0_23 = arith.constant 0 : index
    %c1_24 = arith.constant 1 : index
    %c0_25 = arith.constant 0 : index
    %c0_26 = arith.constant 0 : index
    %39 = vector.load %arg5[%c0_23, %c1_24, %c0_25, %c0_26] : memref<1x4x4x64xf32, #tpu.memory_space<vmem>>, vector<1x1x4x64xf32>
    %40 = vector.shape_cast %39 : vector<1x1x4x64xf32> to vector<4x64xf32>
    %41 = vector.shape_cast %38 : vector<4x64xf32> to vector<1x1x4x64xf32>
    tpu.vector_store %arg5[%c0_23, %c1_24, %c0_25, %c0_26], %41 {strides = array<i32>} : memref<1x4x4x64xf32, #tpu.memory_space<vmem>>, vector<1x1x4x64xf32>,
    %42 = vector.extract_strided_slice %20 {offsets = [3, 0, 0], sizes = [1, 4, 64], strides = [1, 1, 1]} : vector<8x4x64xf32> to vector<1x4x64xf32>
    %43 = vector.shape_cast %42 : vector<1x4x64xf32> to vector<4x64xf32>
    %44 = vector.extract_strided_slice %20 {offsets = [4, 0, 0], sizes = [1, 4, 64], strides = [1, 1, 1]} : vector<8x4x64xf32> to vector<1x4x64xf32>
    %45 = vector.shape_cast %44 : vector<1x4x64xf32> to vector<4x64xf32>
    %46 = arith.maximumf %43, %45 : vector<4x64xf32>
    %47 = vector.extract_strided_slice %20 {offsets = [5, 0, 0], sizes = [1, 4, 64], strides = [1, 1, 1]} : vector<8x4x64xf32> to vector<1x4x64xf32>
    %48 = vector.shape_cast %47 : vector<1x4x64xf32> to vector<4x64xf32>
    %49 = arith.maximumf %46, %48 : vector<4x64xf32>
    %c0_27 = arith.constant 0 : index
    %c2 = arith.constant 2 : index
    %c0_28 = arith.constant 0 : index
    %c0_29 = arith.constant 0 : index
    %50 = vector.load %arg5[%c0_27, %c2, %c0_28, %c0_29] : memref<1x4x4x64xf32, #tpu.memory_space<vmem>>, vector<1x1x4x64xf32>
    %51 = vector.shape_cast %50 : vector<1x1x4x64xf32> to vector<4x64xf32>
    %52 = vector.shape_cast %49 : vector<4x64xf32> to vector<1x1x4x64xf32>
    tpu.vector_store %arg5[%c0_27, %c2, %c0_28, %c0_29], %52 {strides = array<i32>} : memref<1x4x4x64xf32, #tpu.memory_space<vmem>>, vector<1x1x4x64xf32>,
    %53 = vector.extract_strided_slice %20 {offsets = [5, 0, 0], sizes = [1, 4, 64], strides = [1, 1, 1]} : vector<8x4x64xf32> to vector<1x4x64xf32>
    %54 = vector.shape_cast %53 : vector<1x4x64xf32> to vector<4x64xf32>
    %55 = vector.extract_strided_slice %20 {offsets = [6, 0, 0], sizes = [1, 4, 64], strides = [1, 1, 1]} : vector<8x4x64xf32> to vector<1x4x64xf32>
    %56 = vector.shape_cast %55 : vector<1x4x64xf32> to vector<4x64xf32>
    %57 = arith.maximumf %54, %56 : vector<4x64xf32>
    %58 = vector.extract_strided_slice %20 {offsets = [7, 0, 0], sizes = [1, 4, 64], strides = [1, 1, 1]} : vector<8x4x64xf32> to vector<1x4x64xf32>
    %59 = vector.shape_cast %58 : vector<1x4x64xf32> to vector<4x64xf32>
    %60 = arith.maximumf %57, %59 : vector<4x64xf32>
    %c0_30 = arith.constant 0 : index
    %c3 = arith.constant 3 : index
    %c0_31 = arith.constant 0 : index
    %c0_32 = arith.constant 0 : index
    %61 = vector.load %arg5[%c0_30, %c3, %c0_31, %c0_32] : memref<1x4x4x64xf32, #tpu.memory_space<vmem>>, vector<1x1x4x64xf32>
    %62 = vector.shape_cast %61 : vector<1x1x4x64xf32> to vector<4x64xf32>
    %63 = vector.shape_cast %60 : vector<4x64xf32> to vector<1x1x4x64xf32>
    tpu.vector_store %arg5[%c0_30, %c3, %c0_31, %c0_32], %63 {strides = array<i32>} : memref<1x4x4x64xf32, #tpu.memory_space<vmem>>, vector<1x1x4x64xf32>,
    %64 = vector.extract_strided_slice %20 {offsets = [7, 0, 0], sizes = [1, 4, 64], strides = [1, 1, 1]} : vector<8x4x64xf32> to vector<1x4x64xf32>
    %65 = vector.shape_cast %64 : vector<1x4x64xf32> to vector<4x64xf32>
    %c0_33 = arith.constant 0 : index
    %c0_34 = arith.constant 0 : index
    %66 = vector.load %arg7[%c0_33, %c0_34] : memref<4x64xf32, #tpu.memory_space<vmem>>, vector<4x64xf32>
    tpu.vector_store %arg7[%c0_33, %c0_34], %65 {strides = array<i32>} : memref<4x64xf32, #tpu.memory_space<vmem>>, vector<4x64xf32>,
    return
  }
  func.func @transform_0(%arg0: i32, %arg1: i32) -> (i32, i32, i32) {
    %c1_i32 = arith.constant 1 : i32
    %0 = arith.muli %arg0, %c1_i32 : i32
    %1 = arith.addi %0, %arg1 : i32
    %c0_i32 = arith.constant 0 : i32
    %c0_i32_0 = arith.constant 0 : i32
    %c0_i32_1 = arith.constant 0 : i32
    return %1, %c0_i32, %c0_i32_0 : i32, i32, i32
  }
  func.func @transform_1(%arg0: i32, %arg1: i32) -> (i32, i32) {
    %c0_i32 = arith.constant 0 : i32
    %c0_i32_0 = arith.constant 0 : i32
    %c0_i32_1 = arith.constant 0 : i32
    return %c0_i32, %c0_i32_0 : i32, i32
  }
  func.func @transform_2(%arg0: i32, %arg1: i32) -> (i32, i32) {
    %c0_i32 = arith.constant 0 : i32
    %c0_i32_0 = arith.constant 0 : i32
    %c0_i32_1 = arith.constant 0 : i32
    return %c0_i32, %c0_i32_0 : i32, i32
  }
  func.func @transform_3(%arg0: i32, %arg1: i32) -> (i32, i32, i32, i32) {
    %c1_i32 = arith.constant 1 : i32
    %0 = arith.muli %arg0, %c1_i32 : i32
    %1 = arith.addi %0, %arg1 : i32
    %c0_i32 = arith.constant 0 : i32
    %c0_i32_0 = arith.constant 0 : i32
    %c0_i32_1 = arith.constant 0 : i32
    %c0_i32_2 = arith.constant 0 : i32
    return %1, %c0_i32, %c0_i32_0, %c0_i32_1 : i32, i32, i32, i32
  }
}

</mosaic_0001>

<bundles_post_ra>
// kernel: stem_with_batchnorm.1
= control target key start
LH: loop header
LB: loop body
LE: loop exit
PB: predicated region body
PF: predicated region fallthrough
CT: control target
= control target key end

     0   :  { %8 = vsyncpa [#allocation5], 0  ;;  %s1058_s0 = inlined_call_operand.vmem [shape: bf16[2,64,147], index: 0, kind: input, shape index: {}]   ;;  %s1059_s1 = inlined_call_operand.vmem [shape: bf16[147,64], index: 1, kind: input, shape index: {}]   ;;  %s1060_s2 = inlined_call_operand.vmem [shape: f32[1,64], index: 2, kind: input, shape index: {}]   ;;  %s1061_s3 = inlined_call_operand.hbm [shape: f32[2,4,4,64], index: 3, kind: output, shape index: {}]  }
   0x1   :  { %10 = vsyncpa [#allocation5 + $0x1], 0  ;;  %s837_s12 = smov 0   ;;  %s839_s13 = smov 0  }
   0x2   :  { %s841_s14 = smov 0   ;;  %s843_s15 = smov 0  }
   0x3   :  { %s845_s16 = smov 0   ;;  %s847_s17 = smov 0  }
   0x4 LB: > { %s588_s18 = sadd.s32 4294967295, %s809_s17   ;;  %s589_s19 = sadd.s32 4294967294, %s809_s17   ;;  %s809_s17 = sphi %s847_s17, %s16_s17   ;;  %s805_s16 = sphi %s845_s16, %s1068_s16   ;;  %s801_s15 = sphi %s843_s15, %s1067_s15   ;;  %s797_s14 = sphi %s841_s14, %s1066_s14   ;;  %s793_s13 = sphi %s839_s13, %s1065_s13   ;;  %s789_s12 = sphi %s837_s12, %s1064_s12  }
   0x5   : > { %s28_s20 = sadd.s32 1, %s805_s16  ;;  %s107_s21 = sadd.s32 1, %s797_s14 }
   0x6   : > { %p30_p0 = scmp.ge.s32.totalorder %s28_s20, 2  ;;  %p117_p1 = scmp.ne.s32.totalorder %s797_s14, %s793_s13 }
   0x7   : > { %p118_p2 = scmp.eq.s32.totalorder %s588_s18, 1  ;;  %p123_p3 = scmp.ne.s32.totalorder %s793_s13, %s789_s12 }
   0x8   : > { %s1070_s20 = smov (%p30_p0, %s28_s20), 0  ;;  %p124_p5 = scmp.eq.s32.totalorder %s589_s19, 1 }
   0x9   : > { %p877_p4 = por %p118_p2, %p117_p1  ;;  %s104_s23 = ssub.s32 %s805_s16, %s1070_s20 }
   0xa   : > { %p592_p6 = scmp.ge.s32.totalorder %s809_s17, 1  ;;  %p105_p7 = scmp.eq.s32.totalorder %s104_s23, 0 }
   0xb   : > { %p884_p8 = por %p124_p5, %p123_p3  ;;  %p158_p9 = scmp.lt.s32.totalorder %s809_s17, 3 }
   0xc   : > { %s890_s25 = scalar_select %p105_p7, %s797_s14, %s107_s21  }
   0xd   : > { %p159_p10 = pnand %p592_p6, %p158_p9 }
   0xe   : > { %v709_v0 = vld [vmem:[%s1059_s1] sm:$0xff] (!%p159_p10)   ;;  %v811_v1 = vmov (!%p159_p10), 0   ;;  %v710_v2 = vld [vmem:[%s1059_s1 + $0x8] sm:$0xff] (!%p159_p10)   ;;  %v711_v3 = vld [vmem:[%s1059_s1 + $0x10] sm:$0xff] (!%p159_p10)   ;;  %p184_p11 = scmp.lt.s32.totalorder (!%p159_p10), %s801_s15, 1  ;;  %vm196_vm0 = vcmask (!%p159_p10), 519168  }
   0xf   : > { %162 = sbr.rel (%p159_p10) target bundleno = 312 (0x138), region = 32  ;;  %345 = vmatprep.subr.bf16.mxu0 (!%p159_p10), %v811_v1  ;;  %629 = vmatprep.subr.bf16.mxu1 (!%p159_p10), %v811_v1  ;;  %v712_v4 = vld [vmem:[%s1059_s1 + $0x18] sm:$0xff] (!%p159_p10)   ;;  %v812_v5 = vmov (!%p159_p10), 0.0   ;;  %vm325_vm1 = vcmask (!%p159_p10), 154624   ;;  %v713_v7 = vld [vmem:[%s1059_s1 + $0x20] sm:$0xff] (!%p159_p10)   ;;  %v714_v9 = vld [vmem:[%s1059_s1 + $0x28] sm:$0xff] (!%p159_p10)  }
  0x10   : > { %346 = vmatpush1.bf16.msra.mxu0 (!%p159_p10), %v709_v0  ;;  %639 = vmatpush1.bf16.msra.mxu1 (!%p159_p10), %v709_v0  ;;  %197 = vst.msk [vmem:[#allocation3] sm:$0xf] (!%p159_p10), %vm196_vm0, %v812_v5  ;;  %v715_v10 = vld [vmem:[%s1059_s1 + $0x30] sm:$0xff] (!%p159_p10)   ;;  %vm338_vm2 = vcmask (!%p159_p10), 1040384   ;;  %v716_v11 = vld [vmem:[%s1059_s1 + $0x38] sm:$0xff] (!%p159_p10)   ;;  %vm339_vm3 = vcmask (!%p159_p10), 1041408  }
  0x11   : > { %347 = vmatprep.subr.bf16.mxu0 (!%p159_p10), %v811_v1  ;;  %630 = vmatprep.subr.bf16.mxu1 (!%p159_p10), %v811_v1  ;;  %v813_v12 = vmov (!%p159_p10), 65535   ;;  %v717_v14 = vld [vmem:[%s1059_s1 + $0x40] sm:$0xff] (!%p159_p10)   ;;  %v718_v15 = vld [vmem:[%s1059_s1 + $0x48] ss:$0 sps:$4 sm:$0x33] (!%p159_p10)   ;;  %vm418_vm4 = vcmask (!%p159_p10), 516096  }
  0x12   : > { %v340_v13 = vsel (!%p159_p10), %vm338_vm2, 4294967295, %v813_v12  ;;  %419 = vst.msk [vmem:[#allocation2] sm:$0x1] (!%p159_p10), %vm418_vm4, %v812_v5  ;;  %420 = vst.msk [vmem:[#allocation2 + $0x8] sm:$0x1] (!%p159_p10), %vm418_vm4, %v812_v5  ;;  %vm427_vm5 = vcmask (!%p159_p10), 523268  }
  0x13   : > { %v341_v16 = vsel (!%p159_p10), %vm339_vm3, %v340_v13, 0  ;;  %421 = vst.msk [vmem:[#allocation2 + $0x10] sm:$0x1] (!%p159_p10), %vm418_vm4, %v812_v5  ;;  %422 = vst.msk [vmem:[#allocation2 + $0x18] sm:$0x1] (!%p159_p10), %vm418_vm4, %v812_v5  ;;  %s180_s9 = sand.u32 (!%p159_p10), 1, %s793_s13  }
  0x14   : > { %348 = vmatpush1.bf16.msra.mxu0 (!%p159_p10), %v710_v2  ;;  %640 = vmatpush1.bf16.msra.mxu1 (!%p159_p10), %v710_v2  ;;  %v343_v17 = vand.u32 (!%p159_p10), %v718_v15, %v341_v16  ;;  %423 = vst.msk [vmem:[#allocation2 + $0x20] sm:$0x1] (!%p159_p10), %vm418_vm4, %v812_v5  ;;  %424 = vst.msk [vmem:[#allocation2 + $0x28] sm:$0x1] (!%p159_p10), %vm418_vm4, %v812_v5  ;;  %v596_v24 = vld [vmem:[%s1060_s2] ss:$0 sm:$0xff] (!%p159_p10) }
  0x15   : > { %349 = vmatprep.subr.bf16.mxu0 (!%p159_p10), %v811_v1  ;;  %631 = vmatprep.subr.bf16.mxu1 (!%p159_p10), %v811_v1  ;;  %425 = vst.msk [vmem:[#allocation2 + $0x30] sm:$0x1] (!%p159_p10), %vm418_vm4, %v812_v5  ;;  %426 = vst.msk [vmem:[#allocation2 + $0x38] sm:$0x1] (!%p159_p10), %vm418_vm4, %v812_v5  ;;  %s593_s10 = sshll.u32 (!%p159_p10), %s180_s9, 4  ;;  %s628_s18 = sshll.u32 (!%p159_p10), %s801_s15, 8 }
  0x16   : > { %s185_s5 = scalar_select %p184_p11, %s801_s15, 1 }
  0x17   : > { %v484_v58 = vld [vmem:[#allocation3] sm:$0xf]  ;;  %s1000_s26 = scalar_lea.hbm %s1061_s3, %s628_s18  ;;  %s1012_s15 = scalar_lea.sflag [#allocation5], %s180_s9 }
  0x18   : > { %350 = vmatpush1.bf16.msra.mxu0 %v711_v3  ;;  %641 = vmatpush1.bf16.msra.mxu1 %v711_v3  ;;  %s627_s8 = sshll.u32 %s185_s5, 6  ;;  %s814_s28 = smov [#allocation4]  }
  0x19   : > { %351 = vmatprep.subr.bf16.mxu0 %v811_v1  ;;  %632 = vmatprep.subr.bf16.mxu1 %v811_v1  ;;  %s917_s11 = scalar_lea.vmem %s1058_s0, %s627_s8  ;;  %s735_s29 = sshll.u32 %s814_s28, 4  ;;  %s736_s29 = int_to_ptr.vmem [resolvable:$false] %s735_s29 }
  0x1a   : > { %v721_v6 = vld [vmem:[%s917_s11 + $0x4] ss:$8 sps:$4 sm:$0xff]   ;;  %v719_v18 = vld [vmem:[%s917_s11] ss:$8 sps:$4 sm:$0xff]   ;;  %v725_v20 = vld [vmem:[%s917_s11 + $0x14] ss:$8 sps:$4 sm:$0xff]  }
  0x1b   : > { %v724_v8 = vld [vmem:[%s917_s11 + $0x24] ss:$8 sps:$4 sm:$0xff]   ;;  %615 = vmatprep.mubr.msk.bf16.mxu0 %vm325_vm1, %v721_v6  ;;  %v722_v19 = vld [vmem:[%s917_s11 + $0x20] ss:$8 sps:$4 sm:$0xff]   ;;  %v727_v21 = vld [vmem:[%s917_s11 + $0x34] ss:$8 sps:$4 sm:$0xff]  }
  0x1c   : > { %352 = vmatpush1.bf16.msra.mxu0 %v712_v4  ;;  %642 = vmatpush1.bf16.msra.mxu1 %v712_v4  ;;  %v729_v22 = vld [vmem:[%s917_s11 + $0x10] ss:$8 sps:$4 sm:$0xff]   ;;  %s737_s30 = scalar_lea.vmem %s736_s29, 512 }
  0x1d   : > { %353 = vmatprep.subr.bf16.mxu0 %v811_v1  ;;  %633 = vmatprep.subr.bf16.mxu1 %v811_v1  ;;  %v730_v23 = vld [vmem:[%s917_s11 + $0x30] ss:$8 sps:$4 sm:$0xff]   ;;  %s988_s11 = scalar_lea.vmem [#allocation4], %s593_s10 }
  0x1e   : > { %617 = vmatprep.mubr.msk.bf16.mxu1 %vm325_vm1, %v724_v8  ;;  %s517_s19 = sshll.u32 %s988_s11, 4  ;;  %s1002_s19 = int_to_ptr.vmem [resolvable:$true] %s517_s19 }
  0x1f   : > { %s731_s27 = scalar_lea.vmem %s1002_s19, 256  ;;  %p738_p1 = scmp.lt.s32.totalorder %s1002_s19, %s736_s29 }
  0x20   : > { %354 = vmatpush1.bf16.msra.mxu0 %v713_v7  ;;  %643 = vmatpush1.bf16.msra.mxu1 %v713_v7  ;;  %p732_p12 = scmp.ne.s32.totalorder %s1002_s19, %s731_s27  ;;  %p739_p2 = scmp.lt.s32.totalorder %s737_s30, %s731_s27 }
  0x21   : > { %355 = vmatprep.subr.bf16.mxu0 %v811_v1  ;;  %634 = vmatprep.subr.bf16.mxu1 %v811_v1 }
  0x22   : > { %p733_p13 = pnand %p732_p12, %p877_p4  ;;  %p740_p3 = por %p739_p2, %p738_p1 }
  0x24   : > { %356 = vmatpush1.bf16.msra.mxu0 %v714_v9  ;;  %644 = vmatpush1.bf16.msra.mxu1 %v714_v9  ;;  %p734_p0 = pneg %p733_p13 }
  0x25   : > { %357 = vmatprep.subr.bf16.mxu0 %v811_v1  ;;  %635 = vmatprep.subr.bf16.mxu1 %v811_v1 }
  0x26   : > { %p741_p5 = pnand %p740_p3, %p734_p0 }
  0x28   : > { %358 = vmatpush1.bf16.msra.mxu0 %v715_v10  ;;  %645 = vmatpush1.bf16.msra.mxu1 %v715_v10 }
  0x29   : > { %359 = vmatprep.subr.bf16.mxu0 %v811_v1  ;;  %636 = vmatprep.subr.bf16.mxu1 %v811_v1 }
  0x2c   : > { %360 = vmatpush1.bf16.msra.mxu0 %v716_v11  ;;  %646 = vmatpush1.bf16.msra.mxu1 %v716_v11 }
  0x2d   : > { %361 = vmatprep.subr.bf16.mxu0 %v811_v1  ;;  %637 = vmatprep.subr.bf16.mxu1 %v811_v1 }
  0x30   : > { %362 = vmatpush1.bf16.msra.mxu0 %v717_v14  ;;  %647 = vmatpush1.bf16.msra.mxu1 %v717_v14 }
  0x31   : > { %363 = vmatprep.subr.bf16.mxu0 %v811_v1  ;;  %638 = vmatprep.subr.bf16.mxu1 %v811_v1 }
  0x34   : > { %364 = vmatpush1.bf16.msra.mxu0 %v343_v17  ;;  %648 = vmatpush1.bf16.msra.mxu1 %v343_v17 }
  0x37   : > { %378 = vmatmul.mubr.bf16.vlgmr.msra.gmra.mrb[0].mxu0 %v719_v18  ;;  %394 = vmatmul.mubr.bf16.vlgmr.msra.gmra.mrb[0].mxu1 %v722_v19 }
  0x38   : > { %616 = vmatprep.mubr.msk.bf16.mxu0 %vm325_vm1, %v725_v20  ;;  %618 = vmatprep.mubr.msk.bf16.mxu1 %vm325_vm1, %v727_v21 }
  0x3f   : > { %386 = vmatmul.mubr.bf16.gmra.mrb[4].mxu0 %v729_v22  ;;  %402 = vmatmul.mubr.bf16.gmra.mrb[4].mxu1 %v730_v23 }
 0x10a   : > { %v379_v25 = vpop.f32.mrb[0].mxu0  ;;  %v395_v26 = vpop.f32.mrb[0].mxu1 }
 0x10b   : > { %v380_v27 = vadd.f32 %v596_v24, %v379_v25  ;;  %v396_v28 = vadd.f32 %v596_v24, %v395_v26  ;;  %v381_v29 = vpop.f32.mrb[1].mxu0  ;;  %v397_v30 = vpop.f32.mrb[1].mxu1 }
 0x10c   : > { %v382_v31 = vpop.f32.mrb[2].mxu0  ;;  %v398_v32 = vpop.f32.mrb[2].mxu1 }
 0x10d   : > { %v410_v33 = vmax.f32 %v380_v27, 0.0  ;;  %v974_v34 = vmax.f32 %v396_v28, 0.0  ;;  %v383_v35 = vadd.f32 %v596_v24, %v382_v31  ;;  %v399_v36 = vadd.f32 %v596_v24, %v398_v32  ;;  %v384_v37 = vpop.f32.mrb[3].mxu0  ;;  %v400_v38 = vpop.f32.mrb[3].mxu1 }
 0x10f   : > { %428 = vst.msk [vmem:[#allocation2 - $0x3] sm:$0xf0] %vm427_vm5, %v410_v33  ;;  %432 = vst.msk [vmem:[#allocation2 + $0x1d] sm:$0xf0] %vm427_vm5, %v974_v34  ;;  %v411_v39 = vmax.f32 %v383_v35, 0.0  ;;  %v415_v40 = vmax.f32 %v399_v36, 0.0 }
 0x110   : > { %v460_v57 = vrot.slane %v410_v33, 4  ;;  %v464_v15 = vrot.slane %v974_v34, 4 }
 0x111   : > { %429 = vst.msk [vmem:[#allocation2 + $0x5] sm:$0xf0] %vm427_vm5, %v411_v39  ;;  %433 = vst.msk [vmem:[#allocation2 + $0x25] sm:$0xf0] %vm427_vm5, %v415_v40  ;;  %v461_v0 = vrot.slane %v411_v39, 4  ;;  %v465_v7 = vrot.slane %v415_v40, 4 }
 0x112   : > { %v387_v41 = vpop.f32.mrb[4].mxu0  ;;  %v403_v42 = vpop.f32.mrb[4].mxu1 }
 0x113   : > { %v388_v43 = vadd.f32 %v596_v24, %v387_v41  ;;  %v404_v44 = vadd.f32 %v596_v24, %v403_v42  ;;  %v389_v45 = vpop.f32.mrb[5].mxu0  ;;  %v405_v46 = vpop.f32.mrb[5].mxu1 }
 0x114   : > { %v390_v47 = vpop.f32.mrb[6].mxu0  ;;  %v406_v48 = vpop.f32.mrb[6].mxu1 }
 0x115   : > { %v412_v49 = vmax.f32 %v388_v43, 0.0  ;;  %v416_v50 = vmax.f32 %v404_v44, 0.0  ;;  %v391_v51 = vadd.f32 %v596_v24, %v390_v47  ;;  %v407_v52 = vadd.f32 %v596_v24, %v406_v48  ;;  %v392_v53 = vpop.f32.mrb[7].mxu0  ;;  %v408_v54 = vpop.f32.mrb[7].mxu1 }
 0x116   : > { %v436_v55 = vld [vmem:[#allocation2] sm:$0xf] }
 0x117   : > { %v444_v56 = vmax.f32 %v436_v55, %v410_v33  ;;  %430 = vst.msk [vmem:[#allocation2 + $0xd] sm:$0xf0] %vm427_vm5, %v412_v49  ;;  %434 = vst.msk [vmem:[#allocation2 + $0x2d] sm:$0xf0] %vm427_vm5, %v416_v50  ;;  %v413_v60 = vmax.f32 %v391_v51, 0.0  ;;  %v417_v61 = vmax.f32 %v407_v52, 0.0 }
 0x118   : > { %v437_v59 = vld [vmem:[#allocation2 + $0x8] sm:$0xf]  ;;  %v440_v4 = vld [vmem:[#allocation2 + $0x20] sm:$0xf]  ;;  %v462_v11 = vrot.slane %v412_v49, 4  ;;  %v466_v13 = vrot.slane %v416_v50, 4 }
 0x119   : > { %v476_v62 = vmax.f32 %v444_v56, %v460_v57  ;;  %v445_v63 = vmax.f32 %v437_v59, %v411_v39  ;;  %v441_v1 = vld [vmem:[#allocation2 + $0x28] sm:$0xf]  ;;  %431 = vst.msk [vmem:[#allocation2 + $0x15] sm:$0xf0] %vm427_vm5, %v413_v60  ;;  %435 = vst.msk [vmem:[#allocation2 + $0x35] sm:$0xf0] %vm427_vm5, %v417_v61  ;;  %v448_v14 = vmax.f32 %v440_v4, %v974_v34 }
 0x11a   : > { %v449_v6 = vmax.f32 %v441_v1, %v415_v40  ;;  %v463_v22 = vrot.slane %v413_v60, 4  ;;  %v467_v24 = vrot.slane %v417_v61, 4 }
 0x11b   : > { %v485_v2 = vmax.f32 %v484_v58, %v476_v62  ;;  %v477_v3 = vmax.f32 %v445_v63, %v461_v0  ;;  %v480_v27 = vmax.f32 %v448_v14, %v464_v15 }
 0x11c   : > { %v481_v16 = vmax.f32 %v449_v6, %v465_v7 }
 0x11d   : > { %v486_v5 = vmax.f32 %v485_v2, %v477_v3 }
 0x11e   : > { %v438_v8 = vld [vmem:[#allocation2 + $0x10] sm:$0xf] }
 0x11f   : > { %v442_v9 = vld [vmem:[#allocation2 + $0x30] sm:$0xf]  ;;  %488 = vst.msk [vmem:[%s988_s11] sm:$0xf] %vm196_vm0, %v486_v5  ;;  %v446_v10 = vmax.f32 %v438_v8, %v412_v49 }
 0x120   : > { %v450_v12 = vmax.f32 %v442_v9, %v416_v50  ;;  %v439_v19 = vld [vmem:[#allocation2 + $0x18] sm:$0xf] }
 0x121   : > { %v478_v17 = vmax.f32 %v446_v10, %v462_v11  ;;  %v443_v20 = vld [vmem:[#allocation2 + $0x38] sm:$0xf]  ;;  %v447_v21 = vmax.f32 %v439_v19, %v413_v60 }
 0x122   : > { %v482_v18 = vmax.f32 %v450_v12, %v466_v13  ;;  %v451_v23 = vmax.f32 %v443_v20, %v417_v61 }
 0x123   : > { %v489_v25 = vmax.f32 %v477_v3, %v478_v17  ;;  %v479_v28 = vmax.f32 %v447_v21, %v463_v22 }
 0x124   : > { %v497_v26 = vmax.f32 %v481_v16, %v482_v18  ;;  %v483_v29 = vmax.f32 %v451_v23, %v467_v24 }
 0x125   : > { %v490_v30 = vmax.f32 %v489_v25, %v479_v28  ;;  %v493_v31 = vmax.f32 %v479_v28, %v480_v27 }
 0x126   : > { %v498_v32 = vmax.f32 %v497_v26, %v483_v29  ;;  %501 = vst.msk [vmem:[#allocation3] sm:$0xf] %vm196_vm0, %v483_v29 }
 0x127   : > { %619 = vst.msk [vmem:[%s988_s11 + $0x4] sm:$0xf] %vm196_vm0, %v490_v30  ;;  %v494_v33 = vmax.f32 %v493_v31, %v481_v16 }
 0x128   : > { %621 = vst.msk [vmem:[%s988_s11 + $0xc] sm:$0xf] %vm196_vm0, %v498_v32 }
 0x129   : > { %620 = vst.msk [vmem:[%s988_s11 + $0x8] sm:$0xf] %vm196_vm0, %v494_v33 }
 0x12a   : > { %744 = shalt.err (!%p741_p5)
}
 0x12b   : > { %s745_s4 = scalar_lea.hbm %s1000_s26, 256  ;;  %s749_s7 = scalar_lea.hbm %s1061_s3, 512 }
 0x12c   : > { %p746_p6 = scmp.ne.s32.totalorder %s1000_s26, %s745_s4  ;;  %p750_p10 = scmp.lt.u32.totalorder %s1000_s26, %s1061_s3 }
 0x12d   : > { %p751_p11 = scmp.lt.u32.totalorder %s749_s7, %s745_s4  ;;  %p753_p13 = scmp.lt.u32.totalorder %s745_s4, %s1000_s26 }
 0x12e   : > { %p747_p7 = pnand %p746_p6, %p877_p4 }
 0x12f   : > { %p752_p12 = por %p751_p11, %p750_p10 }
 0x130   : > { %p748_p9 = pneg %p747_p7 }
 0x131   : > { %p754_p0 = por %p753_p13, %p752_p12 }
 0x133   : > { %p755_p1 = pnand %p754_p0, %p748_p9 }
 0x135   : > { %758 = shalt.err (!%p755_p1)
}
 0x136   : > { %s815_s10 = smov 64   ;;  %s816_s11 = smov 4  }
 0x137   : > { %649 = dma.vmem_to_hbm [thread:$0]  (%p877_p4), %s1002_s19, 256, %s1000_s26, %s1012_s15, %s815_s10, %s815_s10, %s816_s11  }
 0x138 PF: > { %p655_p2 = scmp.ge.s32.totalorder %s809_s17, 2  ;;  %s532_s18 = sand.u32 1, %s789_s12  }
 0x139   : > { %s533_s21 = scalar_lea.sflag [#allocation5], %s532_s18 }
 0x13a   : > { %p652_p3 = pnand %p655_p2, %p884_p8 }
 0x13c   : > { %784 = dma.done.wait (!%p652_p3), %s533_s21, 256  }
 0x13d   : > { %786 = vsyncadd (!%p652_p3), %s533_s21, 4294967040  ;;  %s16_s17 = sadd.s32 1, %s809_s17   ;;  %s1064_s12 = smov %s793_s13 }
 0x13e   : > { %p13_p5 = scmp.ge.s32.totalorder %s16_s17, 4   ;;  %s1065_s13 = smov %s797_s14 }
 0x13f   : > { %s1066_s14 = smov %s890_s25  ;;  %s1067_s15 = smov %s805_s16 }
 0x140   : > { %s1068_s16 = smov %s1070_s20  ;;  %15 = sbr.rel (!%p13_p5) target bundleno = 4 (0x4), region = 74 }
 0x147   :  { %538 = vsyncpa [#allocation5], 1 }
 0x148   :  { %540 = vsyncpa [#allocation5 + $0x1], 1 }

</bundles_post_ra>
